<compile_context>
chip_gen: v5e
topology: v5e:2x2
jax: 0.10.0
libtpu: 0.0.40
codegen_flags: <defaults>
</compile_context>

<pallas_src>
import functools
import math

import jax
import jax.numpy as jnp
from jax import lax
from jax.experimental import pallas as pl
from jax.experimental.pallas import tpu as pltpu


# ----------------------------------------------------------------------------
# Kernel 1: tiled dense projection  y = x @ W + b   (W stored as [in, out])
# ----------------------------------------------------------------------------
def _linear_kernel(x_ref, w_ref, b_ref, o_ref, acc_ref):
    k = pl.program_id(2)

    @pl.when(k == 0)
    def _():
        acc_ref[...] = jnp.zeros_like(acc_ref)

    acc_ref[...] += jnp.dot(x_ref[...], w_ref[...],
                            preferred_element_type=jnp.float32)

    @pl.when(k == pl.num_programs(2) - 1)
    def _():
        o_ref[...] = (acc_ref[...] + b_ref[...].astype(jnp.float32)).astype(o_ref.dtype)


def _pick_tk(K, tk):
    """Largest multiple of 128 (<= tk) that divides K; else the whole K."""
    if K % tk == 0:
        return tk
    d = (min(tk, K) // 128) * 128
    while d >= 128:
        if K % d == 0:
            return d
        d -= 128
    # TODO(synk): pad K up to a multiple of 128 instead of an un-tiled
    #             reduction when K is large and has no 128-multiple divisor.
    return K


def linear(x2d, w, b, *, tm=512, tn=1024, tk=512):
    """x2d: [M, K], w: [K, N], b: [1, N] -> [M, N]  (tiled, pipelined)."""
    M, K = x2d.shape
    N = w.shape[1]
    tm = min(tm, M)                     # full-extent blocks for small dims
    tn = min(tn, N)
    tk = _pick_tk(K, tk)
    grid = (pl.cdiv(M, tm), pl.cdiv(N, tn), K // tk)
    return pl.pallas_call(
        _linear_kernel,
        out_shape=jax.ShapeDtypeStruct((M, N), x2d.dtype),
        grid=grid,
        in_specs=[
            pl.BlockSpec((tm, tk), lambda i, j, k: (i, k)),
            pl.BlockSpec((tk, tn), lambda i, j, k: (k, j)),
            pl.BlockSpec((1, tn), lambda i, j, k: (0, j)),
        ],
        out_specs=pl.BlockSpec((tm, tn), lambda i, j, k: (i, j)),
        scratch_shapes=[pltpu.VMEM((tm, tn), jnp.float32)],
        compiler_params=pltpu.CompilerParams(
            dimension_semantics=("parallel", "parallel", "arbitrary"),
            vmem_limit_bytes=32 * 1024 * 1024),
    )(x2d, w, b)


# ----------------------------------------------------------------------------
# Kernel 2: multi-head scaled dot-product attention
#   Grid = (batch, q-tile).  All heads of one (batch, q-tile) are processed per
#   step; Q/K/V arrive in [L, H] layout and heads are lane-sliced in VMEM.
#   1/sqrt(head_dim) is already folded into the Q projection weights.
# ----------------------------------------------------------------------------
def _attention_kernel(n_heads, head_dim, has_mask, want_attn, *refs):
    idx = 0
    q_ref = refs[idx]; idx += 1          # (tq, H)
    k_ref = refs[idx]; idx += 1          # (Lk, H)
    v_ref = refs[idx]; idx += 1          # (Lk, H)
    m_ref = None
    if has_mask:
        m_ref = refs[idx]; idx += 1      # (1, Lk) or (tq, Lk)
    ctx_ref = refs[idx]; idx += 1        # (tq, H)
    attn_ref = refs[idx] if want_attn else None   # (nh, tq, Lk)

    q = q_ref[...]
    k = k_ref[...]
    v = v_ref[...]

    if has_mask:
        # Additive bias computed ONCE for all heads (broadcasts over q rows).
        bias = jnp.where(m_ref[...] == 0.0, -1e10, 0.0).astype(jnp.float32)

    mm_dtype = jnp.bfloat16              # MXU-native operands, f32 accumulate
    dense_ctx = (head_dim % 128 == 0)    # per-head ctx stores stay unmasked
    ctx_parts = []

    for h in range(n_heads):             # static unroll over heads
        lo = h * head_dim
        qh = q[:, lo:lo + head_dim].astype(mm_dtype)
        kh = k[:, lo:lo + head_dim].astype(mm_dtype)
        vh = v[:, lo:lo + head_dim].astype(mm_dtype)

        # contract last dims of both operands -> no explicit K transpose
        energy = lax.dot_general(
            qh, kh, dimension_numbers=(((1,), (1,)), ((), ())),
            preferred_element_type=jnp.float32)          # (tq, Lk) f32

        if has_mask:
            energy = energy + bias

        m_row = jnp.max(energy, axis=-1, keepdims=True)
        p = jnp.exp(energy - m_row)
        attn = p * pl.reciprocal(jnp.sum(p, axis=-1, keepdims=True), approx=True)

        if want_attn:
            attn_ref[h] = attn.astype(attn_ref.dtype)    # per-head lane-dense store

        ctx_h = jnp.dot(attn.astype(mm_dtype), vh,
                        preferred_element_type=jnp.float32)
        if dense_ctx:
            ctx_ref[:, lo:lo + head_dim] = ctx_h.astype(ctx_ref.dtype)
        else:
            ctx_parts.append(ctx_h)

    if not dense_ctx:
        ctx_ref[...] = jnp.concatenate(ctx_parts, axis=-1).astype(ctx_ref.dtype)


def _pick_q_tile(Lq, max_tq=512):
    """Largest q-tile (multiple of 8, <= max_tq) that divides Lq."""
    if Lq <= max_tq:
        return Lq
    for d in range(max_tq, 7, -8):
        if Lq % d == 0:
            return d
    return Lq      # TODO(synk): ragged Lq with no multiple-of-8 divisor stays untiled


def attention(Q, K, V, n_heads, mask=None, *, return_attention=True, tq=None):
    """Q: [B, Lq, H], K/V: [B, Lk, H] -> (ctx [B, Lq, H], attn [B, nh, Lq, Lk] | None)."""
    B, Lq, H = Q.shape
    Lk = K.shape[1]
    D = H // n_heads
    has_mask = mask is not None

    tq = _pick_q_tile(Lq) if tq is None else tq
    grid = (B, Lq // tq)
    sq = pl.Squeezed()

    in_specs = [
        pl.BlockSpec((sq, tq, H), lambda b, qi: (b, qi, 0)),
        pl.BlockSpec((sq, Lk, H), lambda b, qi: (b, 0, 0)),   # reused across q-tiles
        pl.BlockSpec((sq, Lk, H), lambda b, qi: (b, 0, 0)),
    ]
    args = [Q, K, V]

    if has_mask:
        m = mask
        if m.ndim == 4:
            # TODO(synk): per-head masks collapse to head 0; broadcast masks only.
            m = m[:, 0]
        elif m.ndim == 2:
            m = m[:, None, :]
        m = m.astype(jnp.float32)        # compact [B, 1|Lq, Lk]; never broadcast in HBM
        mq = m.shape[1]
        if mq == 1:
            in_specs.append(pl.BlockSpec((sq, 1, Lk), lambda b, qi: (b, 0, 0)))
        else:
            assert mq == Lq, f"mask q-dim {mq} must be 1 or Lq={Lq}"
            in_specs.append(pl.BlockSpec((sq, tq, Lk), lambda b, qi: (b, qi, 0)))
        args.append(m)

    out_shapes = [jax.ShapeDtypeStruct((B, Lq, H), Q.dtype)]
    out_specs = [pl.BlockSpec((sq, tq, H), lambda b, qi: (b, qi, 0))]
    if return_attention:
        out_shapes.append(jax.ShapeDtypeStruct((B, n_heads, Lq, Lk), Q.dtype))
        out_specs.append(pl.BlockSpec((sq, n_heads, tq, Lk), lambda b, qi: (b, 0, qi, 0)))

    kernel = functools.partial(_attention_kernel, n_heads, D, has_mask, return_attention)
    outs = pl.pallas_call(
        kernel,
        out_shape=tuple(out_shapes),
        grid=grid,
        in_specs=in_specs,
        out_specs=tuple(out_specs),
        compiler_params=pltpu.CompilerParams(
            dimension_semantics=("parallel", "parallel"),
            vmem_limit_bytes=48 * 1024 * 1024),
    )(*args)

    if return_attention:
        ctx, attn = outs
        return ctx, attn
    return outs[0], None


# ----------------------------------------------------------------------------
# Parameters: raw init (matches nn.Linear layout) + one-time preprocessing
# ----------------------------------------------------------------------------
def init_params(key, hid_dim):
    """Deterministic init of fc_q/fc_k/fc_v/fc_o; weights stored as [in, out]."""
    ks = jax.random.split(key, 8)
    bound = 1.0 / math.sqrt(hid_dim)

    def lin(kw, kb):
        w = jax.random.uniform(kw, (hid_dim, hid_dim), jnp.float32, -bound, bound)
        b = jax.random.uniform(kb, (1, hid_dim), jnp.float32, -bound, bound)
        return w, b

    return {
        "fc_q": lin(ks[0], ks[1]),
        "fc_k": lin(ks[2], ks[3]),
        "fc_v": lin(ks[4], ks[5]),
        "fc_o": lin(ks[6], ks[7]),
    }


def prepare_params(params, n_heads):
    """One-time prep: fold 1/sqrt(head_dim) into fc_q; pre-concat fused QKV."""
    wq, bq = params["fc_q"]
    wk, bk = params["fc_k"]
    wv, bv = params["fc_v"]
    hid_dim = wq.shape[0]
    inv_scale = 1.0 / math.sqrt(hid_dim // n_heads)
    wq_s, bq_s = wq * inv_scale, bq * inv_scale
    return {
        "n_heads": n_heads,
        "fc_q": (wq_s, bq_s),
        "fc_k": (wk, bk),
        "fc_v": (wv, bv),
        "fc_o": params["fc_o"],
        "fc_qkv": (jnp.concatenate([wq_s, wk, wv], axis=1),    # [H, 3H], built once
                   jnp.concatenate([bq_s, bk, bv], axis=1)),   # [1, 3H]
    }


def multi_head_attention(prepared, query, key, value, mask=None, *, return_attention=True):
    """query: [B, Lq, H], key/value: [B, Lk, H] -> (out [B, Lq, H], attn [B, nh, Lq, Lk])."""
    B, Lq, H = query.shape
    Lk = key.shape[1]
    n_heads = prepared["n_heads"]

    if (query is key) and (key is value):
        # Self-attention: fused QKV projection — x read from HBM once,
        # fused weight/bias pre-concatenated in prepare_params (no per-call concat).
        w_qkv, b_qkv = prepared["fc_qkv"]
        qkv = linear(query.reshape(B * Lq, H), w_qkv, b_qkv)
        Q = qkv[:, :H].reshape(B, Lq, H)
        K = qkv[:, H:2 * H].reshape(B, Lk, H)
        V = qkv[:, 2 * H:].reshape(B, Lk, H)
    else:
        Q = linear(query.reshape(B * Lq, H), *prepared["fc_q"]).reshape(B, Lq, H)
        K = linear(key.reshape(B * Lk, H), *prepared["fc_k"]).reshape(B, Lk, H)
        V = linear(value.reshape(B * Lk, H), *prepared["fc_v"]).reshape(B, Lk, H)

    # Heads are split/merged inside the kernel -> no [B,L,H]<->[B,nh,L,D] HBM transposes.
    ctx, attn = attention(Q, K, V, n_heads, mask, return_attention=return_attention)

    wo, bo = prepared["fc_o"]
    out = linear(ctx.reshape(B * Lq, H), wo, bo).reshape(B, Lq, H)
    return out, attn


# ----------------------------------------------------------------------------
# Pure-JAX reference (for correctness checking only) — uses the RAW params
# ----------------------------------------------------------------------------
def reference_mha(params, query, key, value, n_heads, mask=None):
    B, Lq, H = query.shape
    Lk = key.shape[1]
    D = H // n_heads

    def lin(x, w, b):
        return x @ w + b

    Q = lin(query, *params["fc_q"]).reshape(B, Lq, n_heads, D).transpose(0, 2, 1, 3)
    K = lin(key, *params["fc_k"]).reshape(B, Lk, n_heads, D).transpose(0, 2, 1, 3)
    V = lin(value, *params["fc_v"]).reshape(B, Lk, n_heads, D).transpose(0, 2, 1, 3)
    energy = jnp.einsum("bhqd,bhkd->bhqk", Q, K) / math.sqrt(D)
    if mask is not None:
        m = mask
        if m.ndim == 4:
            m = m[:, 0]
        m = jnp.broadcast_to(m, (B, Lq, Lk))[:, None]
        energy = jnp.where(m == 0, -1e10, energy)
    attn = jax.nn.softmax(energy, axis=-1)
    x = jnp.einsum("bhqk,bhkd->bhqd", attn, V).transpose(0, 2, 1, 3).reshape(B, Lq, H)
    out = lin(x, *params["fc_o"])
    return out, attn


if __name__ == "__main__":
    B, Lq, Lk = 2, 8, 8
    hid_dim, n_heads = 32, 4

    root = jax.random.PRNGKey(0)
    kp, kx, kq, kk, kv = jax.random.split(root, 5)

    params = init_params(kp, hid_dim)
    prepared = prepare_params(params, n_heads)

    # --- case 1: self-attention (fused QKV path), no mask -------------------
    x = jax.random.normal(kx, (B, Lq, hid_dim), jnp.float32)
    out1, attn1 = multi_head_attention(prepared, x, x, x)
    jax.block_until_ready((out1, attn1))
    ref_out1, ref_attn1 = reference_mha(params, x, x, x, n_heads)

    assert out1.shape == (B, Lq, hid_dim)
    assert attn1.shape == (B, n_heads, Lq, Lq)
    assert jnp.allclose(out1, ref_out1, atol=2e-2, rtol=2e-2)
    assert jnp.allclose(attn1, ref_attn1, atol=2e-2, rtol=2e-2)

    # --- case 2: cross-attention with a key-padding mask ---------------------
    query = jax.random.normal(kq, (B, Lq, hid_dim), jnp.float32)
    key_in = jax.random.normal(kk, (B, Lk, hid_dim), jnp.float32)
    value = jax.random.normal(kv, (B, Lk, hid_dim), jnp.float32)
    mask = jnp.ones((B, 1, Lk), jnp.float32).at[:, :, -2:].set(0.0)

    out2, attn2 = multi_head_attention(prepared, query, key_in, value, mask)
    jax.block_until_ready((out2, attn2))
    ref_out2, ref_attn2 = reference_mha(params, query, key_in, value, n_heads, mask)

    assert out2.shape == (B, Lq, hid_dim)
    assert attn2.shape == (B, n_heads, Lq, Lk)
    assert jnp.allclose(out2, ref_out2, atol=2e-2, rtol=2e-2)
    assert jnp.allclose(attn2, ref_attn2, atol=2e-2, rtol=2e-2)

    # --- case 3: attn output not requested (HBM-light path) ------------------
    out3, attn3 = multi_head_attention(prepared, x, x, x, return_attention=False)
    jax.block_until_ready(out3)
    assert attn3 is None
    assert jnp.allclose(out3, ref_out1, atol=2e-2, rtol=2e-2)

    print("KERNEL_OK")
</pallas_src>

<mosaic_0001>
module attributes {stable_mosaic.version = 11 : i64} {
  func.func @_linear_kernel(%arg0: i32, %arg1: i32, %arg2: i32, %arg3: memref<16x32xf32, #tpu.memory_space<vmem>>, %arg4: memref<32x96xf32, #tpu.memory_space<vmem>>, %arg5: memref<1x96xf32, #tpu.memory_space<vmem>>, %arg6: memref<16x96xf32, #tpu.memory_space<vmem>>, %arg7: memref<16x96xf32, #tpu.memory_space<vmem>>) attributes {dimension_semantics = [#tpu.dimension_semantics<parallel>, #tpu.dimension_semantics<parallel>, #tpu.dimension_semantics<arbitrary>], iteration_bounds = array<i64: 1, 1, 1>, scalar_prefetch = 0 : i64, scratch_operands = 1 : i64, tpu.core_type = #tpu.core_type<tc>, window_params = [{transform_indices = @transform_0, window_bounds = array<i64: 16, 32>}, {transform_indices = @transform_1, window_bounds = array<i64: 32, 96>}, {transform_indices = @transform_2, window_bounds = array<i64: 1, 96>}, {transform_indices = @transform_3, window_bounds = array<i64: 16, 96>}]} {
    %c0_i32 = arith.constant 0 : i32
    %0 = arith.cmpi eq, %arg2, %c0_i32 : i32
    %1 = arith.extui %0 : i1 to i32
    %c0_i32_0 = arith.constant 0 : i32
    %2 = arith.cmpi ne, %1, %c0_i32_0 : i32
    scf.if %2 {
      %cst_10 = arith.constant 0.000000e+00 : f32
      %12 = vector.broadcast %cst_10 : f32 to vector<16x96xf32>
      %c0_11 = arith.constant 0 : index
      %c0_12 = arith.constant 0 : index
      %13 = vector.load %arg7[%c0_11, %c0_12] : memref<16x96xf32, #tpu.memory_space<vmem>>, vector<16x96xf32>
      tpu.vector_store %arg7[%c0_11, %c0_12], %12 {strides = array<i32>} : memref<16x96xf32, #tpu.memory_space<vmem>>, vector<16x96xf32>,
    } else {
    }
    %c0 = arith.constant 0 : index
    %c0_1 = arith.constant 0 : index
    %3 = vector.load %arg7[%c0, %c0_1] : memref<16x96xf32, #tpu.memory_space<vmem>>, vector<16x96xf32>
    %c0_2 = arith.constant 0 : index
    %c0_3 = arith.constant 0 : index
    %4 = vector.load %arg3[%c0_2, %c0_3] : memref<16x32xf32, #tpu.memory_space<vmem>>, vector<16x32xf32>
    %c0_4 = arith.constant 0 : index
    %c0_5 = arith.constant 0 : index
    %5 = vector.load %arg4[%c0_4, %c0_5] : memref<32x96xf32, #tpu.memory_space<vmem>>, vector<32x96xf32>
    %cst = arith.constant dense<0.000000e+00> : vector<16x96xf32>
    %6 = tpu.matmul %4, %5, %cst {dimension_numbers = #tpu.dot_dimension_numbers<[1], [0], [0], [1], [0, 0, 1, 1], [], []>} : vector<16x32xf32>, vector<32x96xf32>, vector<16x96xf32> -> vector<16x96xf32>
    %7 = arith.addf %3, %6 : vector<16x96xf32>
    %c0_6 = arith.constant 0 : index
    %c0_7 = arith.constant 0 : index
    %8 = vector.load %arg7[%c0_6, %c0_7] : memref<16x96xf32, #tpu.memory_space<vmem>>, vector<16x96xf32>
    tpu.vector_store %arg7[%c0_6, %c0_7], %7 {strides = array<i32>} : memref<16x96xf32, #tpu.memory_space<vmem>>, vector<16x96xf32>,
    %c0_i32_8 = arith.constant 0 : i32
    %9 = arith.cmpi eq, %arg2, %c0_i32_8 : i32
    %10 = arith.extui %9 : i1 to i32
    %c0_i32_9 = arith.constant 0 : i32
    %11 = arith.cmpi ne, %10, %c0_i32_9 : i32
    scf.if %11 {
      %c0_10 = arith.constant 0 : index
      %c0_11 = arith.constant 0 : index
      %12 = vector.load %arg7[%c0_10, %c0_11] : memref<16x96xf32, #tpu.memory_space<vmem>>, vector<16x96xf32>
      %c0_12 = arith.constant 0 : index
      %c0_13 = arith.constant 0 : index
      %13 = vector.load %arg5[%c0_12, %c0_13] : memref<1x96xf32, #tpu.memory_space<vmem>>, vector<1x96xf32>
      %14 = vector.broadcast %13 : vector<1x96xf32> to vector<16x96xf32>
      %15 = arith.addf %12, %14 : vector<16x96xf32>
      %c0_14 = arith.constant 0 : index
      %c0_15 = arith.constant 0 : index
      %16 = vector.load %arg6[%c0_14, %c0_15] : memref<16x96xf32, #tpu.memory_space<vmem>>, vector<16x96xf32>
      tpu.vector_store %arg6[%c0_14, %c0_15], %15 {strides = array<i32>} : memref<16x96xf32, #tpu.memory_space<vmem>>, vector<16x96xf32>,
    } else {
    }
    return
  }
  func.func @transform_0(%arg0: i32, %arg1: i32, %arg2: i32) -> (i32, i32) {
    %c0_i32 = arith.constant 0 : i32
    return %arg0, %arg2 : i32, i32
  }
  func.func @transform_1(%arg0: i32, %arg1: i32, %arg2: i32) -> (i32, i32) {
    %c0_i32 = arith.constant 0 : i32
    return %arg2, %arg1 : i32, i32
  }
  func.func @transform_2(%arg0: i32, %arg1: i32, %arg2: i32) -> (i32, i32) {
    %c0_i32 = arith.constant 0 : i32
    %c0_i32_0 = arith.constant 0 : i32
    return %c0_i32, %arg1 : i32, i32
  }
  func.func @transform_3(%arg0: i32, %arg1: i32, %arg2: i32) -> (i32, i32) {
    %c0_i32 = arith.constant 0 : i32
    return %arg0, %arg1 : i32, i32
  }
}

</mosaic_0001>

<bundles_post_ra>
// kernel: tpu_custom_call.1
= control target key start
LH: loop header
LB: loop body
LE: loop exit
PB: predicated region body
PF: predicated region fallthrough
CT: control target
= control target key end

     0   :  { %8 = vsyncpa [#allocation4], 0  ;;  %s274_s0 = inlined_call_operand.hbm [shape: f32[16,32], index: 0, kind: input, shape index: {}]   ;;  %s275_s1 = inlined_call_operand.hbm [shape: f32[32,96], index: 1, kind: input, shape index: {}]   ;;  %s276_s2 = inlined_call_operand.vmem [shape: f32[1,96], index: 2, kind: input, shape index: {}]   ;;  %s277_s3 = inlined_call_operand.hbm [shape: f32[16,96], index: 3, kind: output, shape index: {}]  }
   0x1   :  { %9 = vsyncpa [#allocation7], 0 }
   0x2   :  { %10 = vsyncpa [#allocation5], 0  ;;  %s15_s14 = sshll.u32 %s274_s0, 4  ;;  %s221_s15 = smov [#allocation3]   ;;  %s16_s14 = int_to_ptr.hbm [resolvable:$true] %s15_s14 }
   0x3   :  { %s17_s16 = sshll.u32 %s221_s15, 4  ;;  %s28_s19 = sshll.u32 %s275_s1, 4  ;;  %s18_s16 = int_to_ptr.vmem [resolvable:$true] %s17_s16  ;;  %s29_s19 = int_to_ptr.hbm [resolvable:$true] %s28_s19 }
   0x4   :  { %s222_s20 = smov 128   ;;  %s223_s21 = smov 8  }
   0x5   :  { %23 = dma.hbm_to_vmem [thread:$0]  %s16_s14, 256, %s18_s16, [#allocation4], %s222_s20, %s222_s20, %s223_s21  }
   0x6   :  { %s224_s22 = smov [#allocation6]  }
   0x7   :  { %s30_s23 = sshll.u32 %s224_s22, 4  ;;  %s31_s23 = int_to_ptr.vmem [resolvable:$true] %s30_s23 }
   0x8   :  { %36 = dma.hbm_to_vmem [thread:$0]  %s29_s19, 512, %s31_s23, [#allocation7], %s222_s20, %s222_s20, %s223_s21  }
   0x9   :  { %215 = dma.done.wait [#allocation4], 256  }
   0xa   :  { %216 = vsyncadd [#allocation4], 4294967040 }
   0xb   :  { %217 = dma.done.wait [#allocation7], 512  }
   0xc   :  { %218 = vsyncadd [#allocation7], 4294966784  ;;  %vm51_vm0 = vcmask 785408   ;;  %v225_v0 = vmov 0.0   ;;  %v61_v1 = vld [vmem:[#allocation6 + $0x18] sm:$0xff]  ;;  %v60_v2 = vld [vmem:[#allocation6 + $0x10] sm:$0xff] }
   0xd   :  { %52 = vst.msk [vmem:[#allocation2] sm:$0xff] %vm51_vm0, %v225_v0  ;;  %81 = vmatpush.msra.mxu0 %v61_v1  ;;  %132 = vmatpush.msra.mxu1 %v61_v1  ;;  %v59_v3 = vld [vmem:[#allocation6 + $0x8] sm:$0xff]  ;;  %v58_v4 = vld [vmem:[#allocation6] sm:$0xff]  ;;  %v56_v5 = vld [vmem:[#allocation3] sm:$0xff]  ;;  %vm62_vm1 = vcmask 261120   ;;  %s226_s24 = smov [#allocation8]  }
   0xe   :  { %53 = vst.msk [vmem:[#allocation2 + $0x8] sm:$0xff] %vm51_vm0, %v225_v0  ;;  %v57_v6 = vld [vmem:[#allocation3 + $0x8] sm:$0xff]  ;;  %v142_v13 = vld [vmem:[%s276_s2] ss:$0 sm:$0xff]  ;;  %s114_s25 = sshll.u32 %s226_s24, 4  ;;  %s116_s28 = sshll.u32 %s277_s3, 4  ;;  %s115_s25 = int_to_ptr.vmem [resolvable:$true] %s114_s25  ;;  %s117_s28 = int_to_ptr.hbm [resolvable:$true] %s116_s28 }
   0xf   :  { %82 = vmatpush.msra.mxu0 %v60_v2  ;;  %133 = vmatpush.msra.mxu1 %v60_v2 }
  0x11   :  { %83 = vmatpush.msra.mxu0 %v59_v3  ;;  %134 = vmatpush.msra.mxu1 %v59_v3 }
  0x13   :  { %84 = vmatpush.msra.mxu0 %v58_v4  ;;  %135 = vmatpush.msra.mxu1 %v58_v4 }
  0x14   :  { %130 = vmatmul.msk.f32.vlgmr.msra.gmra.mxu0 %vm62_vm1, %v56_v5  ;;  %131 = vmatmul.msk.f32.vlgmr.msra.gmra.mxu1 %vm62_vm1, %v57_v6  ;;  %v54_v7 = vld [vmem:[#allocation2] sm:$0xff] }
  0x15   :  { %v55_v8 = vld [vmem:[#allocation2 + $0x8] sm:$0xff] }
  0x91   :  { %v86_v9 = vpop.f32.mrf.mxu0  ;;  %v89_v10 = vpop.f32.mrf.mxu1 }
  0x92   :  { %v92_v11 = vadd.f32 %v86_v9, %v54_v7  ;;  %v93_v12 = vadd.f32 %v89_v10, %v55_v8 }
  0x94   :  { %95 = vst.msk [vmem:[#allocation2] sm:$0xff] %vm51_vm0, %v92_v11 }
  0x95   :  { %96 = vst.msk [vmem:[#allocation2 + $0x8] sm:$0xff] %vm51_vm0, %v93_v12 }
  0x9b   :  { %v100_v14 = vld [vmem:[#allocation2] sm:$0xff] }
  0x9c   :  { %v101_v15 = vld [vmem:[#allocation2 + $0x8] sm:$0xff]  ;;  %v106_v16 = vadd.f32 %v142_v13, %v100_v14 }
  0x9d   :  { %v107_v17 = vadd.f32 %v142_v13, %v101_v15 }
  0x9e   :  { %108 = vst.msk [vmem:[#allocation8] sm:$0xff] %vm51_vm0, %v106_v16 }
  0x9f   :  { %109 = vst.msk [vmem:[#allocation8 + $0x8] sm:$0xff] %vm51_vm0, %v107_v17 }
  0xa0   :  { %122 = dma.vmem_to_hbm [thread:$0]  %s115_s25, 256, %s117_s28, [#allocation5], %s222_s20, %s222_s20, %s223_s21  }
  0xa1   :  { %219 = dma.done.wait [#allocation5], 256  }
  0xa2   :  { %220 = vsyncadd [#allocation5], 4294967040 }
  0xa3   :  { %127 = vsyncpa [#allocation4], 1 }
  0xa4   :  { %128 = vsyncpa [#allocation7], 1 }
  0xa5   :  { %129 = vsyncpa [#allocation5], 1 }

</bundles_post_ra>
